<compile_context>
chip_gen: v7x
topology: tpu7x:2x2x1
jax: 0.10.0
libtpu: 0.0.40
codegen_flags: <defaults>
</compile_context>

<pallas_src>
import jax
import jax.numpy as jnp
from jax.experimental import pallas as pl
from jax.experimental.pallas import tpu as pltpu

SEQ_LEN = 64
EMB_DIM = 160

# Rows-per-block cap: 128 rows of f32[10240] = 5 MiB / block.  With the input
# and output each double-buffered that is ~20 MiB of VMEM; we raise the scoped
# VMEM limit to 32 MiB below so this is safe on every generation.
_MAX_ROWS_PER_BLOCK = 128
_VMEM_LIMIT_BYTES = 32 << 20


def _add_pe_kernel(x_ref, pe_ref, o_ref):
    # x_ref: (TB, F), pe_ref: (1, F) -> broadcast add over the sublane axis.
    o_ref[...] = x_ref[...] + pe_ref[...]


def learned_positional_encoding(x, position_embeddings):
    """x: (B, 64, 160), position_embeddings: (1, 64, 160) -> (B, 64, 160)."""
    B, S, E = x.shape
    assert position_embeddings.shape == (1, S, E)

    F = S * E  # 10240 = 80 * 128 -> lane-dense last dim
    x2 = x.reshape(B, F)
    pe2 = position_embeddings.astype(x.dtype).reshape(1, F)

    # Fuse batch rows per block.  If B <= cap we take the whole batch in one
    # block (block dim == full array dim, so no (8,128) divisibility issue for
    # odd small B); otherwise TB = 128 (multiple of 8) with a cdiv grid and a
    # masked overhanging last block.
    tb = B if B <= _MAX_ROWS_PER_BLOCK else _MAX_ROWS_PER_BLOCK
    grid_b = pl.cdiv(B, tb)

    out2 = pl.pallas_call(
        _add_pe_kernel,
        out_shape=jax.ShapeDtypeStruct((B, F), x.dtype),
        grid_spec=pltpu.PrefetchScalarGridSpec(
            num_scalar_prefetch=0,
            grid=(grid_b,),
            in_specs=[
                # TB batch rows per grid step, lane-dense (TB, 10240) tile.
                pl.BlockSpec((tb, F), lambda b: (b, 0)),
                # Positional table: constant block index -> stays resident in
                # VMEM across the whole grid (no per-step re-DMA).
                pl.BlockSpec((1, F), lambda b: (0, 0)),
            ],
            out_specs=pl.BlockSpec((tb, F), lambda b: (b, 0)),
        ),
        compiler_params=pltpu.CompilerParams(
            dimension_semantics=("parallel",),
            vmem_limit_bytes=_VMEM_LIMIT_BYTES,
        ),
    )(x2, pe2)

    return out2.reshape(B, S, E)


if __name__ == "__main__":
    key = jax.random.PRNGKey(0)
    kx, kp = jax.random.split(key)

    batch = 2
    x = jax.random.normal(kx, (batch, SEQ_LEN, EMB_DIM), dtype=jnp.float32)

    # Parameter shape from __init__: (1, 64, 160).  torch.zeros init would make
    # the test trivial, so initialize deterministically with small randoms.
    position_embeddings = 0.02 * jax.random.normal(
        kp, (1, SEQ_LEN, EMB_DIM), dtype=jnp.float32
    )

    out = learned_positional_encoding(x, position_embeddings)
    out = jax.block_until_ready(out)

    ref = x + position_embeddings  # pure-JAX reference (broadcast add)
    assert out.shape == (batch, SEQ_LEN, EMB_DIM)
    assert out.dtype == x.dtype
    assert jnp.allclose(out, ref, atol=1e-6, rtol=1e-6)

    print("KERNEL_OK")
</pallas_src>

<mosaic_0001>
module attributes {stable_mosaic.version = 11 : i64} {
  func.func @_add_pe_kernel(%arg0: i32, %arg1: memref<2x10240xf32, #tpu.memory_space<vmem>>, %arg2: memref<1x10240xf32, #tpu.memory_space<vmem>>, %arg3: memref<2x10240xf32, #tpu.memory_space<vmem>>) attributes {dimension_semantics = [#tpu.dimension_semantics<parallel>], iteration_bounds = array<i64: 1>, scalar_prefetch = 0 : i64, scratch_operands = 0 : i64, tpu.core_type = #tpu.core_type<tc>, window_params = [{transform_indices = @transform_0, window_bounds = array<i64: 2, 10240>}, {pipeline_mode = #tpu.pipeline_mode<synchronous>, transform_indices = @transform_1, window_bounds = array<i64: 1, 10240>}, {transform_indices = @transform_2, window_bounds = array<i64: 2, 10240>}]} {
    %c0 = arith.constant 0 : index
    %c0_0 = arith.constant 0 : index
    %0 = vector.load %arg1[%c0, %c0_0] : memref<2x10240xf32, #tpu.memory_space<vmem>>, vector<2x10240xf32>
    %c0_1 = arith.constant 0 : index
    %c0_2 = arith.constant 0 : index
    %1 = vector.load %arg2[%c0_1, %c0_2] : memref<1x10240xf32, #tpu.memory_space<vmem>>, vector<1x10240xf32>
    %2 = vector.broadcast %1 : vector<1x10240xf32> to vector<2x10240xf32>
    %3 = arith.addf %0, %2 : vector<2x10240xf32>
    %c0_3 = arith.constant 0 : index
    %c0_4 = arith.constant 0 : index
    %4 = vector.load %arg3[%c0_3, %c0_4] : memref<2x10240xf32, #tpu.memory_space<vmem>>, vector<2x10240xf32>
    tpu.vector_store %arg3[%c0_3, %c0_4], %3 {strides = array<i32>} : memref<2x10240xf32, #tpu.memory_space<vmem>>, vector<2x10240xf32>,
    return
  }
  func.func @transform_0(%arg0: i32) -> (i32, i32) {
    %c0_i32 = arith.constant 0 : i32
    %c0_i32_0 = arith.constant 0 : i32
    return %arg0, %c0_i32 : i32, i32
  }
  func.func @transform_1(%arg0: i32) -> (i32, i32) {
    %c0_i32 = arith.constant 0 : i32
    %c0_i32_0 = arith.constant 0 : i32
    %c0_i32_1 = arith.constant 0 : i32
    return %c0_i32, %c0_i32_0 : i32, i32
  }
  func.func @transform_2(%arg0: i32) -> (i32, i32) {
    %c0_i32 = arith.constant 0 : i32
    %c0_i32_0 = arith.constant 0 : i32
    return %arg0, %c0_i32 : i32, i32
  }
}

</mosaic_0001>

<bundles_post_ra>
// kernel: tpu_custom_call.1
= control target key start
LH: loop header
LB: loop body
LE: loop exit
PB: predicated region body
PF: predicated region fallthrough
CT: control target
= control target key end

     0   :  { %7 = vsyncpa [#allocation3], 0  ;;  %s1081_s0 = inlined_call_operand.hbm [shape: f32[2,10240], index: 0, kind: input, shape index: {}]   ;;  %s1082_s1 = inlined_call_operand.hbm [shape: f32[1,10240], index: 1, kind: input, shape index: {}]   ;;  %s1083_s2 = inlined_call_operand.hbm [shape: f32[2,10240], index: 2, kind: output, shape index: {}]  }
   0x1   :  { %8 = vsyncpa [#allocation6], 0 }
   0x2   :  { %9 = vsyncpa [#allocation4], 0  ;;  %s888_s9 = smov [#allocation2]   ;;  %s889_s11 = smov [#allocation5]  }
   0x3   :  { %s16_s10 = sshll.u32 %s888_s9, 4  ;;  %s26_s12 = sshll.u32 %s889_s11, 4  ;;  %s17_s10 = int_to_ptr.vmem [resolvable:$true] %s16_s10  ;;  %s27_s12 = int_to_ptr.vmem [resolvable:$true] %s26_s12 }
   0x4   :  { %s816_s15 = scalar_lea.hbm %s1081_s0, 2560 }
   0x5   :  { %p817_p0 = scmp.ne.s32.totalorder %s1081_s0, %s816_s15  ;;  %p820_p1 = scmp.lt.u32.totalorder %s816_s15, %s1081_s0 }
   0x7   :  { %p822_p2 = pnand %p820_p1, %p817_p0 }
   0x9   :  { %825 = shalt.err (!%p822_p2)
}
   0xa   :  { %s826_s20 = scalar_lea.vmem %s17_s10, 2560  ;;  %p831_p4 = scmp.lt.s32.totalorder %s17_s10, %s17_s10 }
   0xb   :  { %p827_p3 = scmp.ne.s32.totalorder %s17_s10, %s826_s20  ;;  %p832_p5 = scmp.lt.s32.totalorder %s826_s20, %s826_s20 }
   0xd   :  { %p833_p6 = por %p832_p5, %p831_p4 }
   0xf   :  { %p834_p7 = pnand %p833_p6, %p827_p3 }
  0x11   :  { %837 = shalt.err (!%p834_p7)
}
  0x12   :  { %19 = dma.hbm_to_vmem [thread:$0]  %s1081_s0, 2560, %s17_s10, [#allocation3]  }
  0x13   :  { %s838_s25 = scalar_lea.hbm %s1082_s1, 1280 }
  0x14   :  { %p839_p8 = scmp.ne.s32.totalorder %s1082_s1, %s838_s25  ;;  %p842_p9 = scmp.lt.u32.totalorder %s838_s25, %s1082_s1 }
  0x16   :  { %p844_p10 = pnand %p842_p9, %p839_p8 }
  0x18   :  { %847 = shalt.err (!%p844_p10)
}
  0x19   :  { %s848_s30 = scalar_lea.vmem %s27_s12, 1280  ;;  %p853_p12 = scmp.lt.s32.totalorder %s27_s12, %s27_s12 }
  0x1a   :  { %p849_p11 = scmp.ne.s32.totalorder %s27_s12, %s848_s30  ;;  %p854_p13 = scmp.lt.s32.totalorder %s848_s30, %s848_s30 }
  0x1c   :  { %p855_p0 = por %p854_p13, %p853_p12 }
  0x1e   :  { %p856_p1 = pnand %p855_p0, %p849_p11 }
  0x20   :  { %859 = shalt.err (!%p856_p1)
}
  0x21   :  { %29 = dma.hbm_to_vmem [thread:$0]  %s1082_s1, 1280, %s27_s12, [#allocation6]  }
  0x22   :  { %882 = dma.done.wait [#allocation3], 2560  }
  0x23   :  { %883 = vsyncadd [#allocation3], 4294964736 }
  0x24   :  { %884 = dma.done.wait [#allocation6], 1280  }
  0x25   :  { %885 = vsyncadd [#allocation6], 4294966016  ;;  %v76_v0 = vlaneseq  ;;  %v890_v1 = vmov 1983009808   ;;  %v56_v13 = vld [vmem:[#allocation5] sm:$0xff]  ;;  %v57_v19 = vld [vmem:[#allocation5 + $0x8] sm:$0xff] }
  0x26   :  { %v399_v2 = vunpack.c.l.s4 %v890_v1  ;;  %v58_v36 = vld [vmem:[#allocation5 + $0x10] sm:$0xff]  ;;  %v36_v37 = vld [vmem:[#allocation2] sm:$0xff]  ;;  %v37_v43 = vld [vmem:[#allocation2 + $0x8] sm:$0xff]  ;;  %s891_s1 = smov [#allocation7]  }
  0x27   :  { %v77_v3 = vshrl.u32 %v76_v0, 7  ;;  %v38_v52 = vld [vmem:[#allocation2 + $0x10] sm:$0xff]  ;;  %v59_v60 = vld [vmem:[#allocation5 + $0x18] sm:$0xff]  ;;  %s802_s4 = sshll.u32 %s891_s1, 4  ;;  %s803_s4 = int_to_ptr.vmem [resolvable:$true] %s802_s4 }
  0x28   :  { %v400_v4 = vunpack.c.0.s8 %v399_v2  ;;  %v39_v2 = vld [vmem:[#allocation2 + $0x18] sm:$0xff]  ;;  %s860_s5 = scalar_lea.vmem %s803_s4, 2560  ;;  %p865_p3 = scmp.lt.s32.totalorder %s803_s4, %s803_s4 }
  0x29   :  { %v931_v5 = vsub.s32 0, %v77_v3  ;;  %v933_v6 = vsub.s32 1, %v77_v3  ;;  %v935_v7 = vsub.s32 2, %v77_v3  ;;  %v937_v8 = vsub.s32 3, %v77_v3  ;;  %p861_p2 = scmp.ne.s32.totalorder %s803_s4, %s860_s5  ;;  %p866_p4 = scmp.lt.s32.totalorder %s860_s5, %s860_s5 }
  0x2a   :  { %v939_v9 = vsub.s32 4, %v77_v3  ;;  %v941_v10 = vsub.s32 5, %v77_v3  ;;  %v943_v11 = vsub.s32 6, %v77_v3  ;;  %v945_v12 = vsub.s32 7, %v77_v3 }
  0x2b   :  { %v947_v14 = vsub.s32 %v400_v4, %v77_v3  ;;  %v79_v15 = vrot.slane %v56_v13, %v931_v5  ;;  %v83_v16 = vrot.slane %v56_v13, %v933_v6  ;;  %v87_v17 = vrot.slane %v56_v13, %v935_v7  ;;  %p867_p5 = por %p866_p4, %p865_p3 }
  0x2c   :  { %v91_v18 = vrot.slane %v56_v13, %v937_v8  ;;  %v95_v20 = vrot.slane %v56_v13, %v939_v9  ;;  %v99_v21 = vrot.slane %v56_v13, %v941_v10  ;;  %v103_v22 = vrot.slane %v56_v13, %v943_v11 }
  0x2d   :  { %v107_v23 = vrot.slane %v56_v13, %v945_v12  ;;  %v396_v24 = vcombine.low %v79_v15, %v83_v16  ;;  %v111_v26 = vrot.slane %v57_v19, %v931_v5  ;;  %v115_v27 = vrot.slane %v57_v19, %v933_v6  ;;  %p868_p6 = pnand %p867_p5, %p861_p2 }
  0x2e   :  { %v397_v25 = vcombine.low %v87_v17, %v91_v18  ;;  %v413_v28 = vcombine.low %v95_v20, %v99_v21  ;;  %v119_v30 = vrot.slane %v57_v19, %v935_v7  ;;  %v123_v31 = vrot.slane %v57_v19, %v937_v8 }
  0x2f   :  { %v414_v29 = vcombine.low %v103_v22, %v107_v23  ;;  %v404_v32 = vrot.slane %v396_v24, %v947_v14  ;;  %v430_v34 = vcombine.low %v111_v26, %v115_v27  ;;  %v127_v35 = vrot.slane %v57_v19, %v939_v9  ;;  %v60_v23 = vld [vmem:[#allocation5 + $0x20] sm:$0xff] }
  0x30   :  { %v411_v33 = vrot.slane %v397_v25, %v947_v14  ;;  %v421_v38 = vrot.slane %v413_v28, %v947_v14  ;;  %v431_v40 = vcombine.low %v119_v30, %v123_v31  ;;  %v131_v41 = vrot.slane %v57_v19, %v941_v10  ;;  %v40_v25 = vld [vmem:[#allocation2 + $0x20] sm:$0xff] }
  0x31   :  { %v428_v39 = vrot.slane %v414_v29, %v947_v14  ;;  %v438_v44 = vrot.slane %v430_v34, %v947_v14  ;;  %v135_v45 = vrot.slane %v57_v19, %v943_v11  ;;  %v139_v46 = vrot.slane %v57_v19, %v945_v12 }
  0x32   :  { %v412_v42 = vcombine.low %v404_v32, %v411_v33  ;;  %v445_v48 = vrot.slane %v431_v40, %v947_v14  ;;  %v447_v49 = vcombine.low %v127_v35, %v131_v41  ;;  %v143_v50 = vrot.slane %v58_v36, %v931_v5  ;;  %v41_v33 = vld [vmem:[#allocation2 + $0x28] sm:$0xff] }
  0x33   :  { %v429_v47 = vcombine.low %v421_v38, %v428_v39  ;;  %v448_v53 = vcombine.low %v135_v45, %v139_v46  ;;  %v147_v54 = vrot.slane %v58_v36, %v933_v6  ;;  %v151_v55 = vrot.slane %v58_v36, %v935_v7  ;;  %v61_v46 = vld [vmem:[#allocation5 + $0x28] sm:$0xff] }
  0x34   :  { %v756_v51 = vadd.f32 %v412_v42, %v36_v37  ;;  %v446_v57 = vcombine.low %v438_v44, %v445_v48  ;;  %v455_v58 = vrot.slane %v447_v49, %v947_v14  ;;  %v155_v59 = vrot.slane %v58_v36, %v937_v8  ;;  %v42_v48 = vld [vmem:[#allocation2 + $0x30] sm:$0xff] }
  0x35   :  { %v757_v56 = vadd.f32 %v429_v47, %v37_v43  ;;  %v462_v61 = vrot.slane %v448_v53, %v947_v14  ;;  %v464_v62 = vcombine.low %v143_v50, %v147_v54  ;;  %v159_v63 = vrot.slane %v58_v36, %v939_v9 }
  0x36   :  { %776 = vst [vmem:[#allocation7] sm:$0xff] %v756_v51  ;;  %v163_v0 = vrot.slane %v58_v36, %v941_v10  ;;  %v758_v1 = vadd.f32 %v446_v57, %v38_v52  ;;  %v465_v3 = vcombine.low %v151_v55, %v155_v59  ;;  %v167_v4 = vrot.slane %v58_v36, %v943_v11 }
  0x37   :  { %777 = vst [vmem:[#allocation7 + $0x8] sm:$0xff] %v757_v56  ;;  %v171_v13 = vrot.slane %v58_v36, %v945_v12  ;;  %v463_v15 = vcombine.low %v455_v58, %v462_v61  ;;  %v472_v16 = vrot.slane %v464_v62, %v947_v14  ;;  %v175_v18 = vrot.slane %v59_v60, %v931_v5  ;;  %v43_v56 = vld [vmem:[#allocation2 + $0x38] sm:$0xff] }
  0x38   :  { %v481_v17 = vcombine.low %v159_v63, %v163_v0  ;;  %778 = vst [vmem:[#allocation7 + $0x10] sm:$0xff] %v758_v1  ;;  %v479_v19 = vrot.slane %v465_v3, %v947_v14  ;;  %v179_v21 = vrot.slane %v59_v60, %v933_v6  ;;  %v183_v22 = vrot.slane %v59_v60, %v935_v7 }
  0x39   :  { %v482_v20 = vcombine.low %v167_v4, %v171_v13  ;;  %v759_v24 = vadd.f32 %v463_v15, %v39_v2  ;;  %v187_v27 = vrot.slane %v59_v60, %v937_v8  ;;  %v191_v28 = vrot.slane %v59_v60, %v939_v9  ;;  %v62_v13 = vld [vmem:[#allocation5 + $0x30] sm:$0xff] }
  0x3a   :  { %v489_v26 = vrot.slane %v481_v17, %v947_v14  ;;  %v480_v29 = vcombine.low %v472_v16, %v479_v19  ;;  %v498_v31 = vcombine.low %v175_v18, %v179_v21  ;;  %v195_v32 = vrot.slane %v59_v60, %v941_v10  ;;  %v44_v16 = vld [vmem:[#allocation2 + $0x40] sm:$0xff] }
  0x3b   :  { %v496_v30 = vrot.slane %v482_v20, %v947_v14  ;;  %779 = vst [vmem:[#allocation7 + $0x18] sm:$0xff] %v759_v24  ;;  %v499_v34 = vcombine.low %v183_v22, %v187_v27  ;;  %v199_v35 = vrot.slane %v59_v60, %v943_v11  ;;  %v203_v36 = vrot.slane %v59_v60, %v945_v12  ;;  %v45_v24 = vld [vmem:[#allocation2 + $0x48] sm:$0xff] }
  0x3c   :  { %v207_v37 = vrot.slane %v60_v23, %v931_v5  ;;  %v760_v38 = vadd.f32 %v480_v29, %v40_v25  ;;  %v506_v40 = vrot.slane %v498_v31, %v947_v14  ;;  %v515_v41 = vcombine.low %v191_v28, %v195_v32 }
  0x3d   :  { %v497_v39 = vcombine.low %v489_v26, %v496_v30  ;;  %v513_v42 = vrot.slane %v499_v34, %v947_v14  ;;  %v516_v43 = vcombine.low %v199_v35, %v203_v36  ;;  %v211_v44 = vrot.slane %v60_v23, %v933_v6 }
  0x3e   :  { %v215_v45 = vrot.slane %v60_v23, %v935_v7  ;;  %780 = vst [vmem:[#allocation7 + $0x20] sm:$0xff] %v760_v38  ;;  %v523_v49 = vrot.slane %v515_v41, %v947_v14  ;;  %v219_v50 = vrot.slane %v60_v23, %v937_v8  ;;  %v223_v51 = vrot.slane %v60_v23, %v939_v9 }
  0x3f   :  { %v761_v47 = vadd.f32 %v497_v39, %v41_v33  ;;  %v514_v52 = vcombine.low %v506_v40, %v513_v42  ;;  %v530_v53 = vrot.slane %v516_v43, %v947_v14  ;;  %v532_v54 = vcombine.low %v207_v37, %v211_v44  ;;  %v63_v37 = vld [vmem:[#allocation5 + $0x38] sm:$0xff]  ;;  %v46_v39 = vld [vmem:[#allocation2 + $0x50] sm:$0xff] }
  0x40   :  { %v227_v55 = vrot.slane %v60_v23, %v941_v10  ;;  %v533_v57 = vcombine.low %v215_v45, %v219_v50  ;;  %v231_v58 = vrot.slane %v60_v23, %v943_v11  ;;  %v235_v59 = vrot.slane %v60_v23, %v945_v12 }
  0x41   :  { %781 = vst [vmem:[#allocation7 + $0x28] sm:$0xff] %v761_v47  ;;  %v239_v60 = vrot.slane %v61_v46, %v931_v5  ;;  %v762_v61 = vadd.f32 %v514_v52, %v42_v48  ;;  %v531_v62 = vcombine.low %v523_v49, %v530_v53  ;;  %v540_v63 = vrot.slane %v532_v54, %v947_v14  ;;  %v47_v47 = vld [vmem:[#allocation2 + $0x58] sm:$0xff] }
  0x42   :  { %v549_v0 = vcombine.low %v223_v51, %v227_v55  ;;  %v547_v1 = vrot.slane %v533_v57, %v947_v14  ;;  %v550_v2 = vcombine.low %v231_v58, %v235_v59  ;;  %v243_v3 = vrot.slane %v61_v46, %v933_v6 }
  0x43   :  { %v247_v4 = vrot.slane %v61_v46, %v935_v7  ;;  %782 = vst [vmem:[#allocation7 + $0x30] sm:$0xff] %v762_v61  ;;  %v763_v15 = vadd.f32 %v531_v62, %v43_v56  ;;  %v251_v18 = vrot.slane %v61_v46, %v937_v8  ;;  %v255_v19 = vrot.slane %v61_v46, %v939_v9  ;;  %v48_v62 = vld [vmem:[#allocation2 + $0x60] sm:$0xff] }
  0x44   :  { %v557_v17 = vrot.slane %v549_v0, %v947_v14  ;;  %v548_v20 = vcombine.low %v540_v63, %v547_v1  ;;  %v564_v21 = vrot.slane %v550_v2, %v947_v14  ;;  %v566_v22 = vcombine.low %v239_v60, %v243_v3  ;;  %v64_v60 = vld [vmem:[#allocation5 + $0x40] sm:$0xff] }
  0x45   :  { %v259_v23 = vrot.slane %v61_v46, %v941_v10  ;;  %783 = vst [vmem:[#allocation7 + $0x38] sm:$0xff] %v763_v15  ;;  %v567_v25 = vcombine.low %v247_v4, %v251_v18  ;;  %v263_v26 = vrot.slane %v61_v46, %v943_v11  ;;  %v267_v27 = vrot.slane %v61_v46, %v945_v12  ;;  %v49_v15 = vld [vmem:[#allocation2 + $0x68] sm:$0xff] }
  0x46   :  { %v271_v28 = vrot.slane %v62_v13, %v931_v5  ;;  %v764_v29 = vadd.f32 %v548_v20, %v44_v16  ;;  %v565_v30 = vcombine.low %v557_v17, %v564_v21  ;;  %v574_v31 = vrot.slane %v566_v22, %v947_v14 }
  0x47   :  { %v583_v32 = vcombine.low %v255_v19, %v259_v23  ;;  %v581_v33 = vrot.slane %v567_v25, %v947_v14  ;;  %v584_v34 = vcombine.low %v263_v26, %v267_v27  ;;  %v275_v35 = vrot.slane %v62_v13, %v933_v6 }
  0x48   :  { %v279_v36 = vrot.slane %v62_v13, %v935_v7  ;;  %784 = vst [vmem:[#allocation7 + $0x40] sm:$0xff] %v764_v29  ;;  %v765_v38 = vadd.f32 %v565_v30, %v45_v24  ;;  %v283_v41 = vrot.slane %v62_v13, %v937_v8  ;;  %v287_v42 = vrot.slane %v62_v13, %v939_v9  ;;  %v50_v30 = vld [vmem:[#allocation2 + $0x70] sm:$0xff] }
  0x49   :  { %v591_v40 = vrot.slane %v583_v32, %v947_v14  ;;  %v582_v43 = vcombine.low %v574_v31, %v581_v33  ;;  %v598_v44 = vrot.slane %v584_v34, %v947_v14  ;;  %v600_v45 = vcombine.low %v271_v28, %v275_v35  ;;  %v65_v28 = vld [vmem:[#allocation5 + $0x48] sm:$0xff] }
  0x4a   :  { %v291_v46 = vrot.slane %v62_v13, %v941_v10  ;;  %785 = vst [vmem:[#allocation7 + $0x48] sm:$0xff] %v765_v38  ;;  %v601_v48 = vcombine.low %v279_v36, %v283_v41  ;;  %v295_v49 = vrot.slane %v62_v13, %v943_v11  ;;  %v299_v50 = vrot.slane %v62_v13, %v945_v12  ;;  %v51_v38 = vld [vmem:[#allocation2 + $0x78] sm:$0xff] }
  0x4b   :  { %v303_v51 = vrot.slane %v63_v37, %v931_v5  ;;  %v766_v52 = vadd.f32 %v582_v43, %v46_v39  ;;  %v599_v53 = vcombine.low %v591_v40, %v598_v44  ;;  %v608_v54 = vrot.slane %v600_v45, %v947_v14 }
  0x4c   :  { %v617_v55 = vcombine.low %v287_v42, %v291_v46  ;;  %v615_v56 = vrot.slane %v601_v48, %v947_v14  ;;  %v618_v57 = vcombine.low %v295_v49, %v299_v50  ;;  %v307_v58 = vrot.slane %v63_v37, %v933_v6 }
  0x4d   :  { %v311_v59 = vrot.slane %v63_v37, %v935_v7  ;;  %786 = vst [vmem:[#allocation7 + $0x50] sm:$0xff] %v766_v52  ;;  %v767_v61 = vadd.f32 %v599_v53, %v47_v47  ;;  %v315_v0 = vrot.slane %v63_v37, %v937_v8  ;;  %v319_v1 = vrot.slane %v63_v37, %v939_v9  ;;  %v52_v52 = vld [vmem:[#allocation2 + $0x80] sm:$0xff] }
  0x4e   :  { %v625_v63 = vrot.slane %v617_v55, %v947_v14  ;;  %v616_v2 = vcombine.low %v608_v54, %v615_v56  ;;  %v632_v3 = vrot.slane %v618_v57, %v947_v14  ;;  %v634_v4 = vcombine.low %v303_v51, %v307_v58 }
  0x4f   :  { %v323_v13 = vrot.slane %v63_v37, %v941_v10  ;;  %787 = vst [vmem:[#allocation7 + $0x58] sm:$0xff] %v767_v61  ;;  %v635_v16 = vcombine.low %v311_v59, %v315_v0  ;;  %v327_v17 = vrot.slane %v63_v37, %v943_v11  ;;  %v331_v18 = vrot.slane %v63_v37, %v945_v12  ;;  %v53_v59 = vld [vmem:[#allocation2 + $0x88] sm:$0xff] }
  0x50   :  { %v335_v19 = vrot.slane %v64_v60, %v931_v5  ;;  %v768_v20 = vadd.f32 %v616_v2, %v48_v62  ;;  %v633_v21 = vcombine.low %v625_v63, %v632_v3  ;;  %v642_v22 = vrot.slane %v634_v4, %v947_v14  ;;  %v54_v2 = vld [vmem:[#allocation2 + $0x90] sm:$0xff] }
  0x51   :  { %v651_v23 = vcombine.low %v319_v1, %v323_v13  ;;  %v649_v24 = vrot.slane %v635_v16, %v947_v14  ;;  %v652_v25 = vcombine.low %v327_v17, %v331_v18  ;;  %v339_v26 = vrot.slane %v64_v60, %v933_v6 }
  0x52   :  { %v343_v27 = vrot.slane %v64_v60, %v935_v7  ;;  %788 = vst [vmem:[#allocation7 + $0x60] sm:$0xff] %v768_v20  ;;  %v769_v29 = vadd.f32 %v633_v21, %v49_v15  ;;  %v347_v32 = vrot.slane %v64_v60, %v937_v8  ;;  %v351_v33 = vrot.slane %v64_v60, %v939_v9 }
  0x53   :  { %v659_v31 = vrot.slane %v651_v23, %v947_v14  ;;  %v650_v34 = vcombine.low %v642_v22, %v649_v24  ;;  %v666_v35 = vrot.slane %v652_v25, %v947_v14  ;;  %v668_v36 = vcombine.low %v335_v19, %v339_v26 }
  0x54   :  { %v355_v37 = vrot.slane %v64_v60, %v941_v10  ;;  %789 = vst [vmem:[#allocation7 + $0x68] sm:$0xff] %v769_v29  ;;  %v669_v39 = vcombine.low %v343_v27, %v347_v32  ;;  %v359_v40 = vrot.slane %v64_v60, %v943_v11  ;;  %v363_v41 = vrot.slane %v64_v60, %v945_v12 }
  0x55   :  { %v367_v42 = vrot.slane %v65_v28, %v931_v5  ;;  %v770_v43 = vadd.f32 %v650_v34, %v50_v30  ;;  %v667_v44 = vcombine.low %v659_v31, %v666_v35  ;;  %v676_v45 = vrot.slane %v668_v36, %v947_v14 }
  0x56   :  { %v685_v46 = vcombine.low %v351_v33, %v355_v37  ;;  %v683_v47 = vrot.slane %v669_v39, %v947_v14  ;;  %v686_v48 = vcombine.low %v359_v40, %v363_v41  ;;  %v371_v49 = vrot.slane %v65_v28, %v933_v6 }
  0x57   :  { %v375_v50 = vrot.slane %v65_v28, %v935_v7  ;;  %790 = vst [vmem:[#allocation7 + $0x70] sm:$0xff] %v770_v43  ;;  %v771_v51 = vadd.f32 %v667_v44, %v51_v38  ;;  %v379_v54 = vrot.slane %v65_v28, %v937_v8  ;;  %v383_v5 = vrot.slane %v65_v28, %v939_v9 }
  0x58   :  { %v693_v53 = vrot.slane %v685_v46, %v947_v14  ;;  %v684_v55 = vcombine.low %v676_v45, %v683_v47  ;;  %v700_v56 = vrot.slane %v686_v48, %v947_v14  ;;  %v702_v57 = vcombine.low %v367_v42, %v371_v49 }
  0x59   :  { %v387_v58 = vrot.slane %v65_v28, %v941_v10  ;;  %791 = vst [vmem:[#allocation7 + $0x78] sm:$0xff] %v771_v51  ;;  %v703_v6 = vcombine.low %v375_v50, %v379_v54  ;;  %v391_v7 = vrot.slane %v65_v28, %v943_v11  ;;  %v395_v60 = vrot.slane %v65_v28, %v945_v12  ;;  %v55_v11 = vld [vmem:[#allocation2 + $0x98] sm:$0xff] }
  0x5a   :  { %v772_v61 = vadd.f32 %v684_v55, %v52_v52  ;;  %v701_v62 = vcombine.low %v693_v53, %v700_v56  ;;  %v710_v63 = vrot.slane %v702_v57, %v947_v14 }
  0x5b   :  { %v719_v8 = vcombine.low %v383_v5, %v387_v58  ;;  %v717_v9 = vrot.slane %v703_v6, %v947_v14  ;;  %v720_v0 = vcombine.low %v391_v7, %v395_v60 }
  0x5c   :  { %792 = vst [vmem:[#allocation7 + $0x80] sm:$0xff] %v772_v61  ;;  %v773_v1 = vadd.f32 %v701_v62, %v53_v59 }
  0x5d   :  { %v727_v10 = vrot.slane %v719_v8, %v947_v14  ;;  %v718_v3 = vcombine.low %v710_v63, %v717_v9  ;;  %v734_v4 = vrot.slane %v720_v0, %v947_v14 }
  0x5e   :  { %793 = vst [vmem:[#allocation7 + $0x88] sm:$0xff] %v773_v1 }
  0x5f   :  { %v774_v12 = vadd.f32 %v718_v3, %v54_v2  ;;  %v735_v13 = vcombine.low %v727_v10, %v734_v4 }
  0x61   :  { %794 = vst [vmem:[#allocation7 + $0x90] sm:$0xff] %v774_v12  ;;  %v775_v15 = vadd.f32 %v735_v13, %v55_v11 }
  0x63   :  { %795 = vst [vmem:[#allocation7 + $0x98] sm:$0xff] %v775_v15 }
  0x64   :  { %871 = shalt.err (!%p868_p6)
}
  0x65   :  { %s872_s8 = scalar_lea.hbm %s1083_s2, 2560 }
  0x66   :  { %p873_p7 = scmp.ne.s32.totalorder %s1083_s2, %s872_s8  ;;  %p876_p8 = scmp.lt.u32.totalorder %s872_s8, %s1083_s2 }
  0x68   :  { %p878_p9 = pnand %p876_p8, %p873_p7 }
  0x6a   :  { %881 = shalt.err (!%p878_p9)
}
  0x6b   :  { %805 = dma.vmem_to_hbm [thread:$0]  %s803_s4, 2560, %s1083_s2, [#allocation4]  }
  0x6c   :  { %886 = dma.done.wait [#allocation4], 2560  }
  0x6d   :  { %887 = vsyncadd [#allocation4], 4294964736 }
  0x6e   :  { %809 = vsyncpa [#allocation3], 1 }
  0x6f   :  { %810 = vsyncpa [#allocation6], 1 }
  0x70   :  { %811 = vsyncpa [#allocation4], 1 }

</bundles_post_ra>
